<compile_context>
chip_gen: v7x
topology: tpu7x:2x2x1
jax: 0.10.0
libtpu: 0.0.40
codegen_flags: <defaults>
</compile_context>

<pallas_src>
import jax
import jax.numpy as jnp
from jax import lax
from jax.experimental import pallas as pl
from jax.experimental.pallas import tpu as pltpu

LN_EPS = 1e-12  # BERT LayerNorm eps


def _embed_ln_kernel(x_ref, bias_ref, gamma_ref, beta_ref, o_ref):
    # x_ref/o_ref: (1, TS, H); bias_ref: (1, 1, H) or (1, TS, H) f32;
    # gamma_ref/beta_ref: (1, 1, H) f32.
    e = x_ref[...].astype(jnp.float32) + bias_ref[...]   # broadcasts over rows
    inv_h = 1.0 / e.shape[-1]
    s1 = jnp.sum(e, axis=-1, keepdims=True)
    s2 = jnp.sum(e * e, axis=-1, keepdims=True)
    mean = s1 * inv_h
    var = jnp.maximum(s2 * inv_h - mean * mean, 0.0)
    inv = lax.rsqrt(var + LN_EPS)
    o_ref[...] = ((e - mean) * inv * gamma_ref[...]
                  + beta_ref[...]).astype(o_ref.dtype)
    # TODO(synk): dropout is identity at inference; training-mode dropout
    # (pltpu.prng_random_bits mask) is not emitted here.


def _choose_tile_rows(S, H):
    # ~2 MiB f32 per x tile, rows a multiple of 8, capped at S.
    target = max(8, (2 * 1024 * 1024) // (H * 4))
    target = max(8, (target // 8) * 8)
    if S <= target:
        return S
    return target


@jax.jit
def _pallas_embed_layernorm(x, bias, gamma, beta):
    B, S, H = x.shape
    Sb = bias.shape[1]
    TS = _choose_tile_rows(S, H)
    grid = (B, pl.cdiv(S, TS))

    if Sb == 1:
        bias_spec = pl.BlockSpec((1, 1, H), lambda b, s: (b, 0, 0))
    else:
        bias_spec = pl.BlockSpec((1, TS, H), lambda b, s: (b, s, 0))

    return pl.pallas_call(
        _embed_ln_kernel,
        out_shape=jax.ShapeDtypeStruct((B, S, H), x.dtype),
        grid_spec=pltpu.PrefetchScalarGridSpec(
            num_scalar_prefetch=0,
            grid=grid,
            in_specs=[
                pl.BlockSpec((1, TS, H), lambda b, s: (b, s, 0)),
                bias_spec,
                pl.BlockSpec((1, 1, H), lambda b, s: (0, 0, 0)),
                pl.BlockSpec((1, 1, H), lambda b, s: (0, 0, 0)),
            ],
            out_specs=pl.BlockSpec((1, TS, H), lambda b, s: (b, s, 0)),
        ),
        compiler_params=pltpu.CompilerParams(
            dimension_semantics=("parallel", "parallel"),
            vmem_limit_bytes=32 * 1024 * 1024),
    )(x, bias, gamma, beta)


class CustomEmbeddingLayerPallas:
    """JAX/Pallas re-implementation of CustomEmbeddingLayer.forward."""

    def __init__(self, max_position_embeddings, type_vocab_size, hidden_size,
                 key):
        k1, k2, k3, k4 = jax.random.split(key, 4)
        # Deterministic synthetic parameters (same shapes as BERT embeddings).
        self.position_embeddings = (
            0.02 * jax.random.normal(k1, (max_position_embeddings, hidden_size),
                                     jnp.float32))
        self.token_type_embeddings = (
            0.02 * jax.random.normal(k2, (type_vocab_size, hidden_size),
                                     jnp.float32))
        self.ln_weight = jnp.ones((hidden_size,), jnp.float32) \
            + 0.01 * jax.random.normal(k3, (hidden_size,), jnp.float32)
        self.ln_bias = 0.01 * jax.random.normal(k4, (hidden_size,), jnp.float32)
        self.hidden_size = hidden_size
        # Hoisted (1,1,H) views so the kernel never reshapes/broadcasts params.
        self._gamma = self.ln_weight.reshape(1, 1, hidden_size)
        self._beta = self.ln_bias.reshape(1, 1, hidden_size)

    def __call__(self, input_ids=None, inputs_embeds=None, position_ids=None,
                 token_type_ids=None, past_key_values_length=0):
        if inputs_embeds is None:
            raise ValueError(
                "`inputs_embeds` must be provided for the custom embedding layer.")
        B, S, H = inputs_embeds.shape

        if position_ids is None:
            position_ids = jnp.zeros((B, 1), dtype=jnp.int32)
        if token_type_ids is None:
            token_type_ids = jnp.zeros_like(position_ids, dtype=jnp.int32)

        # Glue: tiny embedding-table gathers; keep the combined bias in f32
        # (tables are f32 in PyTorch and are added before LayerNorm).
        pos_emb = jnp.take(self.position_embeddings, position_ids, axis=0)
        tok_emb = jnp.take(self.token_type_embeddings, token_type_ids, axis=0)
        bias = (pos_emb + tok_emb).astype(jnp.float32)   # [B, 1, H] or [B, S, H]

        return _pallas_embed_layernorm(inputs_embeds, bias,
                                       self._gamma, self._beta)


def _reference(layer, x, position_ids=None, token_type_ids=None):
    B, S, H = x.shape
    if position_ids is None:
        position_ids = jnp.zeros((B, 1), dtype=jnp.int32)
    if token_type_ids is None:
        token_type_ids = jnp.zeros_like(position_ids, dtype=jnp.int32)
    pos = jnp.take(layer.position_embeddings, position_ids, axis=0)
    tok = jnp.take(layer.token_type_embeddings, token_type_ids, axis=0)
    e = x + pos + tok
    mean = jnp.mean(e, axis=-1, keepdims=True)
    var = jnp.mean((e - mean) ** 2, axis=-1, keepdims=True)
    return (e - mean) * lax.rsqrt(var + LN_EPS) * layer.ln_weight + layer.ln_bias


if __name__ == "__main__":
    key = jax.random.PRNGKey(0)
    k_param, k_x = jax.random.split(key)

    B, S, H = 2, 8, 32
    max_pos, type_vocab = 64, 2

    layer = CustomEmbeddingLayerPallas(max_pos, type_vocab, H, k_param)
    inputs_embeds = jax.random.normal(k_x, (B, S, H), jnp.float32)

    out = layer(inputs_embeds=inputs_embeds)
    out = jax.block_until_ready(out)

    ref = _reference(layer, inputs_embeds)
    assert out.shape == (B, S, H)
    assert jnp.allclose(out, ref, atol=1e-5, rtol=1e-5), \
        f"max err {jnp.max(jnp.abs(out - ref))}"

    # Also exercise explicit per-token ids (general bias path).
    pos_ids = jnp.broadcast_to(jnp.arange(S, dtype=jnp.int32)[None, :], (B, S))
    tok_ids = jnp.zeros((B, S), dtype=jnp.int32)
    out2 = jax.block_until_ready(
        layer(inputs_embeds=inputs_embeds, position_ids=pos_ids,
              token_type_ids=tok_ids))
    ref2 = _reference(layer, inputs_embeds, pos_ids, tok_ids)
    assert jnp.allclose(out2, ref2, atol=1e-5, rtol=1e-5), \
        f"max err {jnp.max(jnp.abs(out2 - ref2))}"

    print("KERNEL_OK")
</pallas_src>

<mosaic_0001>
module attributes {stable_mosaic.version = 11 : i64} {
  func.func @_embed_ln_kernel(%arg0: i32, %arg1: i32, %arg2: memref<1x8x32xf32, #tpu.memory_space<vmem>>, %arg3: memref<1x1x32xf32, #tpu.memory_space<vmem>>, %arg4: memref<1x1x32xf32, #tpu.memory_space<vmem>>, %arg5: memref<1x1x32xf32, #tpu.memory_space<vmem>>, %arg6: memref<1x8x32xf32, #tpu.memory_space<vmem>>) attributes {dimension_semantics = [#tpu.dimension_semantics<parallel>, #tpu.dimension_semantics<parallel>], iteration_bounds = array<i64: 2, 1>, scalar_prefetch = 0 : i64, scratch_operands = 0 : i64, tpu.core_type = #tpu.core_type<tc>, window_params = [{transform_indices = @transform_0, window_bounds = array<i64: 1, 8, 32>}, {transform_indices = @transform_1, window_bounds = array<i64: 1, 1, 32>}, {pipeline_mode = #tpu.pipeline_mode<synchronous>, transform_indices = @transform_2, window_bounds = array<i64: 1, 1, 32>}, {pipeline_mode = #tpu.pipeline_mode<synchronous>, transform_indices = @transform_3, window_bounds = array<i64: 1, 1, 32>}, {transform_indices = @transform_4, window_bounds = array<i64: 1, 8, 32>}]} {
    %c0 = arith.constant 0 : index
    %c0_0 = arith.constant 0 : index
    %c0_1 = arith.constant 0 : index
    %0 = vector.load %arg2[%c0, %c0_0, %c0_1] : memref<1x8x32xf32, #tpu.memory_space<vmem>>, vector<1x8x32xf32>
    %c0_2 = arith.constant 0 : index
    %c0_3 = arith.constant 0 : index
    %c0_4 = arith.constant 0 : index
    %1 = vector.load %arg3[%c0_2, %c0_3, %c0_4] : memref<1x1x32xf32, #tpu.memory_space<vmem>>, vector<1x1x32xf32>
    %2 = vector.broadcast %1 : vector<1x1x32xf32> to vector<1x8x32xf32>
    %3 = arith.addf %0, %2 : vector<1x8x32xf32>
    %cst = arith.constant dense<0.000000e+00> : vector<1x8xf32>
    %4 = vector.multi_reduction <add>, %3, %cst [2] : vector<1x8x32xf32> to vector<1x8xf32>
    %5 = vector.shape_cast %4 : vector<1x8xf32> to vector<1x8x1xf32>
    %6 = arith.mulf %3, %3 : vector<1x8x32xf32>
    %cst_5 = arith.constant dense<0.000000e+00> : vector<1x8xf32>
    %7 = vector.multi_reduction <add>, %6, %cst_5 [2] : vector<1x8x32xf32> to vector<1x8xf32>
    %8 = vector.shape_cast %7 : vector<1x8xf32> to vector<1x8x1xf32>
    %cst_6 = arith.constant 3.125000e-02 : f32
    %9 = vector.broadcast %cst_6 : f32 to vector<1x8x1xf32>
    %10 = arith.mulf %5, %9 : vector<1x8x1xf32>
    %cst_7 = arith.constant 3.125000e-02 : f32
    %11 = vector.broadcast %cst_7 : f32 to vector<1x8x1xf32>
    %12 = arith.mulf %8, %11 : vector<1x8x1xf32>
    %13 = arith.mulf %10, %10 : vector<1x8x1xf32>
    %14 = arith.subf %12, %13 : vector<1x8x1xf32>
    %cst_8 = arith.constant 0.000000e+00 : f32
    %15 = vector.broadcast %cst_8 : f32 to vector<1x8x1xf32>
    %16 = arith.maximumf %14, %15 : vector<1x8x1xf32>
    %cst_9 = arith.constant 9.99999996E-13 : f32
    %17 = vector.broadcast %cst_9 : f32 to vector<1x8x1xf32>
    %18 = arith.addf %16, %17 : vector<1x8x1xf32>
    %19 = math.rsqrt %18 : vector<1x8x1xf32>
    %20 = vector.broadcast %10 : vector<1x8x1xf32> to vector<1x8x32xf32>
    %21 = arith.subf %3, %20 : vector<1x8x32xf32>
    %22 = vector.broadcast %19 : vector<1x8x1xf32> to vector<1x8x32xf32>
    %23 = arith.mulf %21, %22 : vector<1x8x32xf32>
    %c0_10 = arith.constant 0 : index
    %c0_11 = arith.constant 0 : index
    %c0_12 = arith.constant 0 : index
    %24 = vector.load %arg4[%c0_10, %c0_11, %c0_12] : memref<1x1x32xf32, #tpu.memory_space<vmem>>, vector<1x1x32xf32>
    %25 = vector.broadcast %24 : vector<1x1x32xf32> to vector<1x8x32xf32>
    %26 = arith.mulf %23, %25 : vector<1x8x32xf32>
    %c0_13 = arith.constant 0 : index
    %c0_14 = arith.constant 0 : index
    %c0_15 = arith.constant 0 : index
    %27 = vector.load %arg5[%c0_13, %c0_14, %c0_15] : memref<1x1x32xf32, #tpu.memory_space<vmem>>, vector<1x1x32xf32>
    %28 = vector.broadcast %27 : vector<1x1x32xf32> to vector<1x8x32xf32>
    %29 = arith.addf %26, %28 : vector<1x8x32xf32>
    %c0_16 = arith.constant 0 : index
    %c0_17 = arith.constant 0 : index
    %c0_18 = arith.constant 0 : index
    %30 = vector.load %arg6[%c0_16, %c0_17, %c0_18] : memref<1x8x32xf32, #tpu.memory_space<vmem>>, vector<1x8x32xf32>
    tpu.vector_store %arg6[%c0_16, %c0_17, %c0_18], %29 {strides = array<i32>} : memref<1x8x32xf32, #tpu.memory_space<vmem>>, vector<1x8x32xf32>,
    return
  }
  func.func @transform_0(%arg0: i32, %arg1: i32) -> (i32, i32, i32) {
    %c0_i32 = arith.constant 0 : i32
    %c0_i32_0 = arith.constant 0 : i32
    return %arg0, %arg1, %c0_i32 : i32, i32, i32
  }
  func.func @transform_1(%arg0: i32, %arg1: i32) -> (i32, i32, i32) {
    %c0_i32 = arith.constant 0 : i32
    %c0_i32_0 = arith.constant 0 : i32
    %c0_i32_1 = arith.constant 0 : i32
    return %arg0, %c0_i32, %c0_i32_0 : i32, i32, i32
  }
  func.func @transform_2(%arg0: i32, %arg1: i32) -> (i32, i32, i32) {
    %c0_i32 = arith.constant 0 : i32
    %c0_i32_0 = arith.constant 0 : i32
    %c0_i32_1 = arith.constant 0 : i32
    %c0_i32_2 = arith.constant 0 : i32
    return %c0_i32, %c0_i32_0, %c0_i32_1 : i32, i32, i32
  }
  func.func @transform_3(%arg0: i32, %arg1: i32) -> (i32, i32, i32) {
    %c0_i32 = arith.constant 0 : i32
    %c0_i32_0 = arith.constant 0 : i32
    %c0_i32_1 = arith.constant 0 : i32
    %c0_i32_2 = arith.constant 0 : i32
    return %c0_i32, %c0_i32_0, %c0_i32_1 : i32, i32, i32
  }
  func.func @transform_4(%arg0: i32, %arg1: i32) -> (i32, i32, i32) {
    %c0_i32 = arith.constant 0 : i32
    %c0_i32_0 = arith.constant 0 : i32
    return %arg0, %arg1, %c0_i32 : i32, i32, i32
  }
}

</mosaic_0001>

<bundles_post_ra>
// kernel: _pallas_embed_layernorm.1
= control target key start
LH: loop header
LB: loop body
LE: loop exit
PB: predicated region body
PF: predicated region fallthrough
CT: control target
= control target key end

     0   :  { %9 = vsyncpa [#allocation3], 0  ;;  %s802_s0 = inlined_call_operand.hbm [shape: f32[2,8,32], index: 0, kind: input, shape index: {}]   ;;  %s803_s1 = inlined_call_operand.vmem [shape: f32[2,1,32], index: 1, kind: input, shape index: {}]   ;;  %s804_s2 = inlined_call_operand.vmem [shape: f32[1,1,32], index: 2, kind: input, shape index: {}]   ;;  %s805_s3 = inlined_call_operand.vmem [shape: f32[1,1,32], index: 3, kind: input, shape index: {}]   ;;  %s806_s4 = inlined_call_operand.hbm [shape: f32[2,8,32], index: 4, kind: output, shape index: {}]  }
   0x1   :  { %11 = vsyncpa [#allocation3 + $0x1], 0 }
   0x2   :  { %12 = vsyncpa [#allocation4], 0 }
   0x3   :  { %14 = vsyncpa [#allocation4 + $0x1], 0  ;;  %s612_s15 = smov 0   ;;  %s614_s16 = smov 0  }
   0x4   :  { %s616_s17 = smov 0   ;;  %s618_s18 = smov 0  }
   0x5   :  { %s620_s19 = smov 0   ;;  %s622_s20 = smov 0  }
   0x6 LB: > { %s391_s21 = sadd.s32 4294967295, %s583_s20   ;;  %s392_s22 = sadd.s32 4294967294, %s583_s20   ;;  %s583_s20 = sphi %s622_s20, %s20_s20   ;;  %s579_s19 = sphi %s620_s19, %s822_s19   ;;  %s575_s18 = sphi %s618_s18, %s821_s18   ;;  %s571_s17 = sphi %s616_s17, %s820_s17   ;;  %s567_s16 = sphi %s614_s16, %s819_s16   ;;  %s563_s15 = sphi %s612_s15, %s818_s15  }
   0x7   : > { %s32_s23 = sadd.s32 1, %s579_s19  ;;  %s41_s24 = sadd.s32 1, %s571_s17 }
   0x8   : > { %p34_p0 = scmp.ge.s32.totalorder %s32_s23, 2  ;;  %p48_p1 = scmp.ne.s32.totalorder %s571_s17, %s567_s16 }
   0x9   : > { %p49_p2 = scmp.eq.s32.totalorder %s583_s20, 0  ;;  %p54_p3 = scmp.ne.s32.totalorder %s567_s16, %s563_s15 }
   0xa   : > { %s824_s23 = smov (%p34_p0, %s32_s23), 0  ;;  %p55_p5 = scmp.eq.s32.totalorder %s391_s21, 0 }
   0xb   : > { %p653_p4 = por %p49_p2, %p48_p1  ;;  %s36_s26 = ssub.s32 %s579_s19, %s824_s23 }
   0xc   : > { %p148_p6 = scmp.eq.s32.totalorder %s391_s21, 1  ;;  %p39_p7 = scmp.eq.s32.totalorder %s36_s26, 0 }
   0xd   : > { %p659_p8 = por %p55_p5, %p54_p3  ;;  %p154_p10 = scmp.eq.s32.totalorder %s392_s22, 1 }
   0xe   : > { %p663_p9 = por %p148_p6, %p48_p1  ;;  %p419_p13 = scmp.lt.s32.totalorder %s583_s20, 2 }
   0xf   : > { %s668_s29 = scalar_select %p39_p7, %s571_s17, %s41_s24  }
  0x10   : > { %s810_s28 = scalar_select %p663_p9, 1, 0 }
  0x11   : > { %p670_p11 = por %p154_p10, %p54_p3  ;;  %s180_s5 = sand.u32 1, %s571_s17  }
  0x12   : > { %s395_s6 = sshll.u32 %s180_s5, 3  ;;  %s396_s7 = sshll.u32 %s579_s19, 7 }
  0x13   : > { %s811_s30 = scalar_select %p670_p11, 1, 0 }
  0x14   : > { %s681_s10 = scalar_lea.hbm %s802_s0, %s396_s7  ;;  %s184_s11 = scalar_lea.vmem [#allocation2], %s395_s6 }
  0x15   : > { %s192_s12 = sshll.u32 %s184_s11, 4  ;;  %p687_p0 = pnand %p419_p13, %p653_p4  ;;  %s683_s12 = int_to_ptr.vmem [resolvable:$true] %s192_s12 }
  0x16   : > { %s181_s14 = scalar_lea.sflag [#allocation3], %s180_s5  ;;  %s471_s21 = scalar_lea.hbm %s681_s10, 128 }
  0x17   : > { %p472_p3 = scmp.ne.s32.totalorder %s681_s10, %s471_s21  ;;  %p473_p5 = pneg %p687_p0 }
  0x18   : > { %s476_s25 = scalar_lea.hbm %s802_s0, 256  ;;  %p477_p4 = scmp.lt.u32.totalorder %s681_s10, %s802_s0 }
  0x19   : > { %p474_p6 = pnand %p473_p5, %p472_p3  ;;  %p478_p10 = scmp.lt.u32.totalorder %s476_s25, %s471_s21 }
  0x1a   : > { %p480_p12 = scmp.lt.u32.totalorder %s471_s21, %s681_s10 }
  0x1b   : > { %p475_p7 = pneg %p474_p6  ;;  %p479_p13 = por %p478_p10, %p477_p4 }
  0x1d   : > { %p481_p1 = por %p480_p12, %p479_p13 }
  0x1f   : > { %p482_p2 = pnand %p481_p1, %p475_p7 }
  0x21   : > { %485 = shalt.err (!%p482_p2)
}
  0x22   : > { %s486_s5 = scalar_lea.vmem %s683_s12, 128  ;;  %s585_s7 = smov [#allocation2]  }
  0x23   : > { %p487_p3 = scmp.ne.s32.totalorder %s683_s12, %s486_s5  ;;  %s491_s8 = sshll.u32 %s585_s7, 4  ;;  %s492_s8 = int_to_ptr.vmem [resolvable:$false] %s491_s8 }
  0x24   : > { %s493_s9 = scalar_lea.vmem %s492_s8, 256  ;;  %p494_p9 = scmp.lt.s32.totalorder %s683_s12, %s492_s8 }
  0x25   : > { %p489_p6 = pnand %p487_p3, %p473_p5  ;;  %p495_p4 = scmp.lt.s32.totalorder %s493_s9, %s486_s5 }
  0x27   : > { %p490_p11 = pneg %p489_p6  ;;  %p496_p10 = por %p495_p4, %p494_p9 }
  0x29   : > { %p497_p12 = pnand %p496_p10, %p490_p11 }
  0x2b   : > { %500 = shalt.err (!%p497_p12)
}
  0x2c   : > { %414 = dma.hbm_to_vmem [thread:$0]  (!%p687_p0), %s681_s10, 128, %s683_s12, %s181_s14  }
  0x2d   : > { %p813_p1 = scmp.lt.s32.totalorder %s583_s20, 3  ;;  %p814_p2 = scmp.ge.s32.totalorder %s583_s20, 1 }
  0x2f   : > { %p204_p5 = pnand %p814_p2, %p813_p1 }
  0x30   : > { %s723_s11 = sand.u32 (!%p204_p5), 1, %s567_s16  }
  0x31   : > { %207 = sbr.rel (%p204_p5) target bundleno = 251 (0xfb), region = 36  ;;  %s398_s21 = sshll.u32 (!%p204_p5), %s723_s11, 3 }
  0x32   : > { %s210_s22 = scalar_lea.sflag (!%p204_p5), [#allocation3], %s723_s11  ;;  %s213_s13 = scalar_lea.vmem (!%p204_p5), [#allocation2], %s398_s21 }
  0x38   : > { %554 = dma.done.wait (%p659_p8), %s210_s22, 128  }
  0x39   : > { %556 = vsyncadd (%p659_p8), %s210_s22, 4294967168  ;;  %p241_p9 = scmp.lt.s32.totalorder %s575_s18, 1  ;;  %v244_v0 = vld [vmem:[%s213_s13] sm:$0xff]  ;;  %vm253_vm0 = vcmask 261120   ;;  %s404_s5 = sshll.u32 %s575_s18, 7 }
  0x3a   : > { %v401_v16 = vld [vmem:[%s804_s2] ss:$0 sm:$0xff]  ;;  %s240_s7 = scalar_lea.vmem [#allocation5], %s398_s21  ;;  %s752_s13 = scalar_lea.hbm %s806_s4, %s404_s5 }
  0x3b   : > { %s242_s10 = scalar_select %p241_p9, %s575_s18, 1  ;;  %v402_v18 = vld [vmem:[%s805_s3] ss:$0 sm:$0xff] }
  0x3c   : > { %s302_s8 = sshll.u32 %s240_s7, 4  ;;  %p815_p11 = scmp.ne.s32.totalorder %s810_s28, 0  ;;  %s754_s8 = int_to_ptr.vmem [resolvable:$true] %s302_s8 }
  0x3d   : > { %s243_s24 = scalar_lea.vmem %s803_s1, %s242_s10  ;;  %s288_s10 = scalar_lea.sflag [#allocation4], %s723_s11 }
  0x3e   : > { %v400_v1 = vld [vmem:[%s243_s24] ss:$0 sm:$0xff]  ;;  %s501_s12 = scalar_lea.vmem %s754_s8, 128  ;;  %s586_s18 = smov [#allocation5]  }
  0x3f   : > { %v252_v2 = vadd.f32 %v400_v1, %v244_v0  ;;  %p502_p8 = scmp.ne.s32.totalorder %s754_s8, %s501_s12  ;;  %s505_s21 = sshll.u32 %s586_s18, 4  ;;  %s506_s21 = int_to_ptr.vmem [resolvable:$false] %s505_s21 }
  0x40   : > { %s507_s14 = scalar_lea.vmem %s506_s21, 256  ;;  %p508_p13 = scmp.lt.s32.totalorder %s754_s8, %s506_s21 }
  0x41   : > { %v254_v3 = vsel %vm253_vm0, %v252_v2, 0.0  ;;  %v257_v4 = vmul.f32 %v252_v2, %v252_v2  ;;  %p503_p0 = pnand %p502_p8, %p815_p11  ;;  %p509_p3 = scmp.lt.s32.totalorder %s507_s14, %s501_s12 }
  0x42   : > { %255 = vadd.xlane.f32.xlu0 %v254_v3 }
  0x43   : > { %v258_v5 = vsel %vm253_vm0, %v257_v4, 0.0  ;;  %p504_p7 = pneg %p503_p0  ;;  %p510_p6 = por %p509_p3, %p508_p13 }
  0x45   : > { %p511_p4 = pnand %p510_p6, %p504_p7 }
  0x46   : > { %259 = vadd.xlane.f32.xlu0 %v258_v5 }
  0xcf   : > { %v256_v6 = vpop.xlane.xlu0 %255 }
  0xd0   : > { %v261_v7 = vmul.f32 0.03125, %v256_v6 }
  0xd2   : > { %v263_v9 = vmul.f32 %v261_v7, %v261_v7  ;;  %v268_v14 = vsub.f32 %v252_v2, %v261_v7 }
  0xd3   : > { %v260_v8 = vpop.xlane.xlu0 %259 }
  0xd4   : > { %v262_v10 = vmul.f32 0.03125, %v260_v8 }
  0xd6   : > { %v264_v11 = vsub.f32 %v262_v10, %v263_v9 }
  0xd8   : > { %v265_v12 = vmax.f32 %v264_v11, 0.0 }
  0xda   : > { %v266_v13 = vadd.f32 1e-12, %v265_v12 }
  0xdc   : > { %469 = vrsqrt.f32 %v266_v13 }
  0xe6   : > { %v470_v15 = vpop.eup %469 }
  0xe7   : > { %v269_v17 = vmul.f32 %v470_v15, %v268_v14 }
  0xe9   : > { %v277_v19 = vmul.f32 %v401_v16, %v269_v17 }
  0xeb   : > { %v285_v20 = vadd.f32 %v402_v18, %v277_v19 }
  0xed   : > { %286 = vst.msk [vmem:[%s240_s7] sm:$0xff] %vm253_vm0, %v285_v20 }
  0xee   : > { %514 = shalt.err (!%p511_p4)
}
  0xef   : > { %s515_s11 = scalar_lea.hbm %s752_s13, 128  ;;  %s519_s25 = scalar_lea.hbm %s806_s4, 256 }
  0xf0   : > { %p516_p10 = scmp.ne.s32.totalorder %s752_s13, %s515_s11  ;;  %p520_p2 = scmp.lt.u32.totalorder %s752_s13, %s806_s4 }
  0xf1   : > { %p521_p5 = scmp.lt.u32.totalorder %s519_s25, %s515_s11  ;;  %p523_p8 = scmp.lt.u32.totalorder %s515_s11, %s752_s13 }
  0xf2   : > { %p517_p12 = pnand %p516_p10, %p815_p11 }
  0xf3   : > { %p522_p9 = por %p521_p5, %p520_p2 }
  0xf4   : > { %p518_p1 = pneg %p517_p12 }
  0xf5   : > { %p524_p0 = por %p523_p8, %p522_p9 }
  0xf7   : > { %p525_p7 = pnand %p524_p0, %p518_p1 }
  0xf9   : > { %528 = shalt.err (!%p525_p7)
}
  0xfa   : > { %409 = dma.vmem_to_hbm [thread:$0]  (%p815_p11), %s754_s8, 128, %s752_s13, %s288_s10  }
  0xfb PF: > { %s314_s5 = sand.u32 1, %s563_s15   ;;  %p816_p13 = scmp.ne.s32.totalorder %s811_s30, 0 }
  0xfc   : > { %p817_p3 = scmp.ge.s32.totalorder %s583_s20, 2  ;;  %s315_s7 = scalar_lea.sflag [#allocation4], %s314_s5 }
  0xfe   : > { %p416_p6 = pnand %p817_p3, %p816_p13 }
 0x100   : > { %558 = dma.done.wait (!%p416_p6), %s315_s7, 128  }
 0x101   : > { %560 = vsyncadd (!%p416_p6), %s315_s7, 4294967168  ;;  %s20_s20 = sadd.s32 1, %s583_s20   ;;  %s818_s15 = smov %s567_s16 }
 0x102   : > { %p17_p4 = scmp.ge.s32.totalorder %s20_s20, 4   ;;  %s819_s16 = smov %s571_s17 }
 0x103   : > { %s820_s17 = smov %s668_s29  ;;  %s821_s18 = smov %s579_s19 }
 0x104   : > { %s822_s19 = smov %s824_s23  ;;  %19 = sbr.rel (!%p17_p4) target bundleno = 6 (0x6), region = 84 }
 0x10b   :  { %320 = vsyncpa [#allocation3], 1 }
 0x10c   :  { %322 = vsyncpa [#allocation3 + $0x1], 1 }
 0x10d   :  { %323 = vsyncpa [#allocation4], 1 }
 0x10e   :  { %325 = vsyncpa [#allocation4 + $0x1], 1 }

</bundles_post_ra>
